<compile_context>
chip_gen: v6e
topology: v6e:2x2x1
jax: 0.10.0
libtpu: 0.0.40
codegen_flags: <defaults>
</compile_context>

<pallas_src>
import jax
import jax.numpy as jnp
from jax import lax
from jax.experimental import pallas as pl
from jax.experimental.pallas import tpu as pltpu


def _round_up(n: int, m: int) -> int:
    return ((n + m - 1) // m) * m


def _make_kernel(D1: int, TD1: int, TB: int, TD2: int, nk: int):
    """Kernel factory; all tile parameters are static (closed over)."""
    n_sub = TD1 // 8                      # 8-row slabs per D1 block
    ragged = (nk * TD1) != D1             # does the last block overhang D1?
    NEG_INF = float("-inf")
    BIG = 1 << 30

    if n_sub % 8 == 0:
        unroll = 8
    elif n_sub % 4 == 0:
        unroll = 4
    elif n_sub % 2 == 0:
        unroll = 2
    else:
        unroll = 1

    def kernel(x_ref, o_ref, max_sc, idx_sc):
        k = pl.program_id(2)

        @pl.when(k == 0)
        def _init():
            max_sc[...] = jnp.full(max_sc.shape, NEG_INF, dtype=max_sc.dtype)
            idx_sc[...] = jnp.zeros(idx_sc.shape, dtype=idx_sc.dtype)

        slab_base = k * n_sub             # global slab id of slab 0 in block
        row_base = k * TD1                # global row index of row 0 in block

        def scan(masked):
            if masked:
                # sublane position 0..7, used only to mask the D1 tail
                pos8 = lax.broadcasted_iota(jnp.int32, (8, TD2), 0)

            def body_b(b, carry):
                m8_0 = max_sc[b]          # (8, TD2) running max per sublane slot
                i8_0 = idx_sc[b]          # (8, TD2) running global slab id

                def body_s(s, st):
                    m8, i8 = st
                    off = pl.multiple_of(s * 8, 8)
                    slab = x_ref[b, pl.ds(off, 8), :]      # (8, TD2)
                    if slab.dtype != jnp.float32:
                        slab = slab.astype(jnp.float32)
                    if masked:
                        # rows >= D1 (grid overhang along dim1) never win
                        thresh = D1 - (row_base + s * 8)
                        slab = jnp.where(pos8 < thresh, slab, NEG_INF)
                    better = slab > m8    # strict: first occurrence wins
                    g = slab_base + s
                    i8 = jnp.where(better, g, i8)
                    m8 = jnp.where(better, slab, m8)
                    return m8, i8

                m8, i8 = lax.fori_loop(0, n_sub, body_s, (m8_0, i8_0),
                                       unroll=unroll)
                max_sc[b] = m8
                idx_sc[b] = i8
                return carry

            lax.fori_loop(0, TB, body_b, 0)

        if not ragged:
            scan(False)
        elif nk == 1:
            scan(True)
        else:
            @pl.when(k < nk - 1)
            def _full_blocks():
                scan(False)

            @pl.when(k == nk - 1)
            def _tail_block():
                scan(True)

        @pl.when(k == nk - 1)
        def _finalize():
            m8 = max_sc[...]                                   # (TB, 8, TD2)
            i8 = idx_sc[...]
            pos = lax.broadcasted_iota(jnp.int32, m8.shape, 1)
            rows = i8 * 8 + pos                                # global row ids
            mtop = jnp.max(m8, axis=1, keepdims=True)
            # smallest row index among sublane slots achieving the max
            cand = jnp.where(m8 == mtop, rows, jnp.int32(BIG))
            o_ref[...] = jnp.min(cand, axis=1)

    return kernel


def argmax_dim1(x: jax.Array, *, block_bytes: int = 4 * 1024 * 1024) -> jax.Array:
    """Argmax over axis=1 of a (B, D1, D2) float array -> (B, D2) int32."""
    B, D1, D2 = x.shape
    assert jnp.issubdtype(x.dtype, jnp.floating), "kernel assumes floating input"
    esize = jnp.dtype(x.dtype).itemsize

    # ---- batch tile (output sublane dim): multiple of 8 or full extent -----
    TB = B if B < 8 else 8
    nb = pl.cdiv(B, TB)

    # ---- lane tile: biggest D2 tile for DMA contiguity, capped so the
    #      per-row running state stays register-resident -----------------------
    MAX_TD2 = 1024
    if D2 <= MAX_TD2:
        TD2 = D2
    else:
        TD2 = MAX_TD2
        for cand in range(MAX_TD2, 127, -128):
            if D2 % cand == 0:
                TD2 = cand
                break
    # v7x: make sure >=2 blocks exist along a parallel axis when possible
    if nb * pl.cdiv(D2, TD2) < 2 and D2 > 128:
        TD2 = max(128, _round_up((D2 + 1) // 2, 128))
    nj = pl.cdiv(D2, TD2)

    # ---- reduction tile: multiple of 8, as big as the block budget allows ---
    D1_8 = _round_up(max(D1, 1), 8)
    td1_cap = max(8, (block_bytes // max(1, TB * TD2 * esize)) // 8 * 8)
    TD1 = min(D1_8, td1_cap)
    nk = pl.cdiv(D1, TD1)

    # ---- if D1 fits in one block and the block is still small, grow TB to
    #      amortize per-grid-step overhead (keep >=2 batch blocks for v7x) ----
    if B > TB and nk == 1:
        blk = TB * TD1 * TD2 * esize
        if blk < block_bytes:
            factor = max(1, block_bytes // blk)
            tb_lim = max(8, _round_up((B + 1) // 2, 8)) if B >= 16 else 8
            TB = min(max(TB, (TB * factor) // 8 * 8), tb_lim, 64)
            nb = pl.cdiv(B, TB)

    grid = (nb, nj, nk)
    kernel = _make_kernel(D1, TD1, TB, TD2, nk)

    cost = pl.CostEstimate(
        flops=3 * B * D1 * D2,
        transcendentals=0,
        bytes_accessed=B * D1 * D2 * esize + B * D2 * 4,
    )

    out = pl.pallas_call(
        kernel,
        out_shape=jax.ShapeDtypeStruct((B, D2), jnp.int32),
        grid=grid,
        in_specs=[pl.BlockSpec((TB, TD1, TD2), lambda b, j, k: (b, k, j))],
        out_specs=pl.BlockSpec((TB, TD2), lambda b, j, k: (b, j)),
        scratch_shapes=[
            pltpu.VMEM((TB, 8, TD2), jnp.float32),   # running max per sublane slot
            pltpu.VMEM((TB, 8, TD2), jnp.int32),     # running slab id per slot
        ],
        compiler_params=pltpu.CompilerParams(
            dimension_semantics=("parallel", "parallel", "arbitrary"),
            vmem_limit_bytes=48 * 1024 * 1024,
        ),
        cost_estimate=cost,
    )(x)
    return out


if __name__ == "__main__":
    key = jax.random.PRNGKey(0)

    tests = [
        ((2, 16, 128), {}),                              # small smoke test
        ((16, 256, 256), {}),                            # KernelBench shape
        ((3, 200, 300), {}),                             # ragged B(<8) and D2
        ((5, 203, 257), {}),                             # ragged D1 (not mult of 8)
        ((10, 64, 256), {}),                             # partial last batch block
        ((4, 5, 64), {}),                                # tiny D1 (< 8)
        ((2, 1000, 256), {"block_bytes": 128 * 1024}),   # multi-block D1 reduction
    ]
    for i, (shape, kw) in enumerate(tests):
        B, D1, D2 = shape
        k = jax.random.fold_in(key, i)
        x = jax.random.normal(k, shape, dtype=jnp.float32)

        out = jax.block_until_ready(argmax_dim1(x, **kw))
        ref = jnp.argmax(x, axis=1).astype(jnp.int32)

        assert out.shape == (B, D2), (out.shape, (B, D2))
        assert out.dtype == jnp.int32, out.dtype
        assert bool(jnp.all(out == ref)), f"mismatch vs jnp.argmax for {shape}"

    # tie-heavy input exercises first-occurrence merge across slabs/slots
    xt = jnp.floor(jax.random.normal(jax.random.fold_in(key, 99),
                                     (6, 40, 200), dtype=jnp.float32) * 1.5)
    out = jax.block_until_ready(argmax_dim1(xt))
    ref = jnp.argmax(xt, axis=1).astype(jnp.int32)
    assert bool(jnp.all(out == ref)), "tie-break mismatch vs jnp.argmax"

    print("KERNEL_OK")
</pallas_src>

<mosaic_0001>
module attributes {stable_mosaic.version = 11 : i64} {
  func.func @kernel(%arg0: i32, %arg1: i32, %arg2: i32, %arg3: memref<2x16x128xf32, #tpu.memory_space<vmem>>, %arg4: memref<2x128xi32, #tpu.memory_space<vmem>>, %arg5: memref<2x8x128xf32, #tpu.memory_space<vmem>>, %arg6: memref<2x8x128xi32, #tpu.memory_space<vmem>>) attributes {dimension_semantics = [#tpu.dimension_semantics<parallel>, #tpu.dimension_semantics<parallel>, #tpu.dimension_semantics<arbitrary>], iteration_bounds = array<i64: 1, 1, 1>, scalar_prefetch = 0 : i64, scratch_operands = 2 : i64, tpu.core_type = #tpu.core_type<tc>, window_params = [{transform_indices = @transform_0, window_bounds = array<i64: 2, 16, 128>}, {transform_indices = @transform_1, window_bounds = array<i64: 2, 128>}]} {
    %c0_i32 = arith.constant 0 : i32
    %0 = arith.cmpi eq, %arg2, %c0_i32 : i32
    %1 = arith.extui %0 : i1 to i32
    %c0_i32_0 = arith.constant 0 : i32
    %2 = arith.cmpi ne, %1, %c0_i32_0 : i32
    scf.if %2 {
      %cst = arith.constant 0xFF800000 : f32
      %8 = vector.broadcast %cst : f32 to vector<2x8x128xf32>
      %c0 = arith.constant 0 : index
      %c0_6 = arith.constant 0 : index
      %c0_7 = arith.constant 0 : index
      %9 = vector.load %arg5[%c0, %c0_6, %c0_7] : memref<2x8x128xf32, #tpu.memory_space<vmem>>, vector<2x8x128xf32>
      tpu.vector_store %arg5[%c0, %c0_6, %c0_7], %8 {strides = array<i32>} : memref<2x8x128xf32, #tpu.memory_space<vmem>>, vector<2x8x128xf32>,
      %c0_i32_8 = arith.constant 0 : i32
      %10 = vector.broadcast %c0_i32_8 : i32 to vector<2x8x128xi32>
      %c0_9 = arith.constant 0 : index
      %c0_10 = arith.constant 0 : index
      %c0_11 = arith.constant 0 : index
      %11 = vector.load %arg6[%c0_9, %c0_10, %c0_11] : memref<2x8x128xi32, #tpu.memory_space<vmem>>, vector<2x8x128xi32>
      tpu.vector_store %arg6[%c0_9, %c0_10, %c0_11], %10 {strides = array<i32>} : memref<2x8x128xi32, #tpu.memory_space<vmem>>, vector<2x8x128xi32>,
    } else {
    }
    %c2_i32 = arith.constant 2 : i32
    %3 = arith.muli %arg2, %c2_i32 : i32
    %c0_i32_1 = arith.constant 0 : i32
    %c2_i32_2 = arith.constant 2 : i32
    %4 = arith.addi %c0_i32_1, %c2_i32_2 : i32
    %c1_i32 = arith.constant 1 : i32
    scf.for %arg7 = %c0_i32_1 to %4 step %c1_i32  : i32 {
      %8 = arith.index_cast %arg7 : i32 to index
      %c0 = arith.constant 0 : index
      %c0_6 = arith.constant 0 : index
      %9 = vector.load %arg5[%8, %c0, %c0_6] : memref<2x8x128xf32, #tpu.memory_space<vmem>>, vector<1x8x128xf32>
      %10 = vector.shape_cast %9 : vector<1x8x128xf32> to vector<8x128xf32>
      %11 = arith.index_cast %arg7 : i32 to index
      %c0_7 = arith.constant 0 : index
      %c0_8 = arith.constant 0 : index
      %12 = vector.load %arg6[%11, %c0_7, %c0_8] : memref<2x8x128xi32, #tpu.memory_space<vmem>>, vector<1x8x128xi32>
      %13 = vector.shape_cast %12 : vector<1x8x128xi32> to vector<8x128xi32>
      %c0_i32_9 = arith.constant 0 : i32
      %c8_i32 = arith.constant 8 : i32
      %14 = arith.muli %c0_i32_9, %c8_i32 : i32
      %15 = tpu.assume_multiple %14, 8 : i32
      %16 = arith.index_cast %arg7 : i32 to index
      %17 = arith.index_cast %15 : i32 to index
      %c0_10 = arith.constant 0 : index
      %18 = vector.load %arg3[%16, %17, %c0_10] : memref<2x16x128xf32, #tpu.memory_space<vmem>>, vector<1x8x128xf32>
      %19 = vector.shape_cast %18 : vector<1x8x128xf32> to vector<8x128xf32>
      %20 = arith.cmpf ogt, %19, %10 : vector<8x128xf32>
      %21 = arith.addi %3, %c0_i32_9 : i32
      %22 = vector.broadcast %21 : i32 to vector<8x128xi32>
      %23 = arith.select %20, %22, %13 : vector<8x128xi1>, vector<8x128xi32>
      %24 = arith.select %20, %19, %10 : vector<8x128xi1>, vector<8x128xf32>
      %c1_i32_11 = arith.constant 1 : i32
      %c8_i32_12 = arith.constant 8 : i32
      %25 = arith.muli %c1_i32_11, %c8_i32_12 : i32
      %26 = tpu.assume_multiple %25, 8 : i32
      %27 = arith.index_cast %arg7 : i32 to index
      %28 = arith.index_cast %26 : i32 to index
      %c0_13 = arith.constant 0 : index
      %29 = vector.load %arg3[%27, %28, %c0_13] : memref<2x16x128xf32, #tpu.memory_space<vmem>>, vector<1x8x128xf32>
      %30 = vector.shape_cast %29 : vector<1x8x128xf32> to vector<8x128xf32>
      %31 = arith.cmpf ogt, %30, %24 : vector<8x128xf32>
      %32 = arith.addi %3, %c1_i32_11 : i32
      %33 = vector.broadcast %32 : i32 to vector<8x128xi32>
      %34 = arith.select %31, %33, %23 : vector<8x128xi1>, vector<8x128xi32>
      %35 = arith.select %31, %30, %24 : vector<8x128xi1>, vector<8x128xf32>
      %c2_i32_14 = arith.constant 2 : i32
      %36 = arith.index_cast %arg7 : i32 to index
      %c0_15 = arith.constant 0 : index
      %c0_16 = arith.constant 0 : index
      %37 = vector.load %arg5[%36, %c0_15, %c0_16] : memref<2x8x128xf32, #tpu.memory_space<vmem>>, vector<1x8x128xf32>
      %38 = vector.shape_cast %37 : vector<1x8x128xf32> to vector<8x128xf32>
      %39 = vector.shape_cast %35 : vector<8x128xf32> to vector<1x8x128xf32>
      tpu.vector_store %arg5[%36, %c0_15, %c0_16], %39 {strides = array<i32>} : memref<2x8x128xf32, #tpu.memory_space<vmem>>, vector<1x8x128xf32>,
      %40 = arith.index_cast %arg7 : i32 to index
      %c0_17 = arith.constant 0 : index
      %c0_18 = arith.constant 0 : index
      %41 = vector.load %arg6[%40, %c0_17, %c0_18] : memref<2x8x128xi32, #tpu.memory_space<vmem>>, vector<1x8x128xi32>
      %42 = vector.shape_cast %41 : vector<1x8x128xi32> to vector<8x128xi32>
      %43 = vector.shape_cast %34 : vector<8x128xi32> to vector<1x8x128xi32>
      tpu.vector_store %arg6[%40, %c0_17, %c0_18], %43 {strides = array<i32>} : memref<2x8x128xi32, #tpu.memory_space<vmem>>, vector<1x8x128xi32>,
    }
    %c2_i32_3 = arith.constant 2 : i32
    %c0_i32_4 = arith.constant 0 : i32
    %5 = arith.cmpi eq, %arg2, %c0_i32_4 : i32
    %6 = arith.extui %5 : i1 to i32
    %c0_i32_5 = arith.constant 0 : i32
    %7 = arith.cmpi ne, %6, %c0_i32_5 : i32
    scf.if %7 {
      %c0 = arith.constant 0 : index
      %c0_6 = arith.constant 0 : index
      %c0_7 = arith.constant 0 : index
      %8 = vector.load %arg5[%c0, %c0_6, %c0_7] : memref<2x8x128xf32, #tpu.memory_space<vmem>>, vector<2x8x128xf32>
      %c0_8 = arith.constant 0 : index
      %c0_9 = arith.constant 0 : index
      %c0_10 = arith.constant 0 : index
      %9 = vector.load %arg6[%c0_8, %c0_9, %c0_10] : memref<2x8x128xi32, #tpu.memory_space<vmem>>, vector<2x8x128xi32>
      %10 = tpu.iota {dimensions = array<i32: 1>} : vector<2x8x128xi32>
      %c8_i32 = arith.constant 8 : i32
      %11 = vector.broadcast %c8_i32 : i32 to vector<2x8x128xi32>
      %12 = arith.muli %9, %11 : vector<2x8x128xi32>
      %13 = arith.addi %12, %10 : vector<2x8x128xi32>
      %cst = arith.constant dense<0xFF800000> : vector<2x128xf32>
      %14 = vector.multi_reduction <maximumf>, %8, %cst [1] : vector<2x8x128xf32> to vector<2x128xf32>
      %15 = vector.shape_cast %14 : vector<2x128xf32> to vector<2x1x128xf32>
      %16 = vector.broadcast %15 : vector<2x1x128xf32> to vector<2x8x128xf32>
      %17 = arith.cmpf oeq, %8, %16 : vector<2x8x128xf32>
      %c1073741824_i32 = arith.constant 1073741824 : i32
      %18 = vector.broadcast %c1073741824_i32 : i32 to vector<2x8x128xi32>
      %19 = arith.select %17, %13, %18 : vector<2x8x128xi1>, vector<2x8x128xi32>
      %cst_11 = arith.constant dense<2147483647> : vector<2x128xi32>
      %20 = vector.multi_reduction <minsi>, %19, %cst_11 [1] : vector<2x8x128xi32> to vector<2x128xi32>
      %c0_12 = arith.constant 0 : index
      %c0_13 = arith.constant 0 : index
      %21 = vector.load %arg4[%c0_12, %c0_13] : memref<2x128xi32, #tpu.memory_space<vmem>>, vector<2x128xi32>
      tpu.vector_store %arg4[%c0_12, %c0_13], %20 {strides = array<i32>} : memref<2x128xi32, #tpu.memory_space<vmem>>, vector<2x128xi32>,
    } else {
    }
    return
  }
  func.func @transform_0(%arg0: i32, %arg1: i32, %arg2: i32) -> (i32, i32, i32) {
    %c0_i32 = arith.constant 0 : i32
    return %arg0, %arg2, %arg1 : i32, i32, i32
  }
  func.func @transform_1(%arg0: i32, %arg1: i32, %arg2: i32) -> (i32, i32) {
    %c0_i32 = arith.constant 0 : i32
    return %arg0, %arg1 : i32, i32
  }
}

</mosaic_0001>

<bundles_post_ra>
// kernel: tpu_custom_call.1
= control target key start
LH: loop header
LB: loop body
LE: loop exit
PB: predicated region body
PF: predicated region fallthrough
CT: control target
= control target key end

     0   :  { %6 = vsyncpa [#allocation5], 0  ;;  %s232_s0 = inlined_call_operand.hbm [shape: f32[2,16,128], index: 0, kind: input, shape index: {}]   ;;  %s233_s1 = inlined_call_operand.hbm [shape: s32[2,128], index: 1, kind: output, shape index: {}]  }
   0x1   :  { %7 = vsyncpa [#allocation6], 0  ;;  %s210_s6 = smov [#allocation4]  }
   0x2   :  { %s13_s7 = sshll.u32 %s210_s6, 4  ;;  %s14_s7 = int_to_ptr.vmem [resolvable:$true] %s13_s7 }
   0x3   :  { %s166_s8 = scalar_lea.vmem %s14_s7, 512  ;;  %p171_p1 = scmp.lt.s32.totalorder %s14_s7, %s14_s7 }
   0x4   :  { %p167_p0 = scmp.ne.s32.totalorder %s14_s7, %s166_s8  ;;  %p172_p2 = scmp.lt.s32.totalorder %s166_s8, %s166_s8 }
   0x6   :  { %p173_p3 = por %p172_p2, %p171_p1 }
   0x8   :  { %p174_p4 = pnand %p173_p3, %p167_p0 }
   0xa   :  { %177 = shalt.err (!%p174_p4)
}
   0xb   :  { %s211_s9 = smov 128   ;;  %s212_s10 = smov 8  }
   0xc   :  { %19 = dma.hbm_to_vmem [thread:$0]  %s232_s0, 512, %s14_s7, [#allocation5], %s211_s9, %s211_s9, %s212_s10  }
   0xd   :  { %202 = dma.done.wait [#allocation5], 512  }
   0xe   :  { %203 = vsyncadd [#allocation5], 4294966784  ;;  %v213_v0 = vmov -inf   ;;  %v214_v1 = vmov 0   ;;  %s206_s13 = smov 0  }
   0xf   :  { %27 = vst [vmem:[#allocation2] sm:$0xff] %v213_v0  ;;  %28 = vst [vmem:[#allocation2 + $0x8] sm:$0xff] %v213_v0 }
  0x10   :  { %29 = vst [vmem:[#allocation3] sm:$0xff] %v214_v1  ;;  %30 = vst [vmem:[#allocation3 + $0x8] sm:$0xff] %v214_v1 }
  0x11 LB: > { %s140_s14 = sshll.u32 %s208_s13, 3  ;;  %s141_s15 = sshll.u32 %s208_s13, 4  ;;  %s208_s13 = sphi %s206_s13, %s37_s13  }
  0x12   : > { %s39_s16 = scalar_lea.vmem [#allocation2], %s140_s14  ;;  %s45_s17 = scalar_lea.vmem [#allocation4], %s141_s15 }
  0x13   : > { %v46_v3 = vld [vmem:[%s45_s17] sm:$0xff]  ;;  %v143_v4 = vld [vmem:[%s45_s17 + $0x8] sm:$0xff]  ;;  %s41_s0 = scalar_lea.vmem [#allocation3], %s140_s14  ;;  %s37_s13 = sadd.s32 1, %s208_s13  }
  0x14   : > { %p34_p5 = scmp.ge.s32.totalorder %s37_s13, 2  }
  0x15   :  { %v68_v14 = vlaneseq (%p34_p5)  ;;  %s215_s18 = smov (%p34_p5), [#allocation7]   ;;  %vm108_vm8 = vcmask (%p34_p5), 1041409  }
  0x16   : > { %v40_v2 = vld [vmem:[%s39_s16] sm:$0xff]  ;;  %s117_s19 = sshll.u32 (%p34_p5), %s215_s18, 4  ;;  %s118_s19 = int_to_ptr.vmem [resolvable:$true] %s117_s19 }
  0x17   : > { %vm47_vm0 = vcmp.gt.f32.partialorder %v46_v3, %v40_v2  ;;  %v42_v5 = vld [vmem:[%s41_s0] sm:$0xff]  ;;  %36 = sbr.rel (!%p34_p5) target bundleno = 17 (0x11), region = 47  ;;  %v69_v21 = vshrl.u32 (%p34_p5), %v68_v14, 7  ;;  %s178_s20 = scalar_lea.vmem (%p34_p5), %s118_s19, 32 }
  0x18   : > { %v50_v6 = vsel %vm47_vm0, %v46_v3, %v40_v2  ;;  %v49_v7 = vsel %vm47_vm0, 0, %v42_v5  ;;  %p179_p6 = scmp.ne.s32.totalorder (%p34_p5), %s118_s19, %s178_s20  ;;  %p183_p7 = scmp.lt.s32.totalorder (%p34_p5), %s118_s19, %s118_s19 }
  0x19   : > { %vm54_vm1 = vcmp.gt.f32.partialorder %v143_v4, %v50_v6  ;;  %p184_p8 = scmp.lt.s32.totalorder (%p34_p5), %s178_s20, %s178_s20 }
  0x1a   : > { %v58_v8 = vsel %vm54_vm1, %v143_v4, %v50_v6  ;;  %v57_v9 = vsel %vm54_vm1, 1, %v49_v7 }
  0x1b   : > { %59 = vst [vmem:[%s39_s16] sm:$0xff] %v58_v8  ;;  %60 = vst [vmem:[%s41_s0] sm:$0xff] %v57_v9  ;;  %p185_p9 = por (%p34_p5), %p184_p8, %p183_p7 }
  0x1d   :  { %p186_p10 = pnand %p185_p9, %p179_p6 }
  0x22   :  { %v64_v10 = vld [vmem:[#allocation2] sm:$0xff]  ;;  %v65_v11 = vld [vmem:[#allocation2 + $0x8] sm:$0xff]  ;;  %v66_v15 = vld [vmem:[#allocation3] sm:$0xff] }
  0x23   :  { %v74_v12 = vrot.slane %v64_v10, 4  ;;  %v80_v13 = vrot.slane %v65_v11, 4  ;;  %v67_v16 = vld [vmem:[#allocation3 + $0x8] sm:$0xff]  ;;  %v70_v22 = vmul.u32 8, %v66_v15 }
  0x24   :  { %v71_v23 = vmul.u32 8, %v67_v16 }
  0x25   :  { %v75_v17 = vmax.f32 %v64_v10, %v74_v12  ;;  %v81_v18 = vmax.f32 %v65_v11, %v80_v13  ;;  %v72_v28 = vadd.s32 %v70_v22, %v69_v21 }
  0x26   :  { %v73_v29 = vadd.s32 %v71_v23, %v69_v21 }
  0x27   :  { %v76_v19 = vrot.slane %v75_v17, 2  ;;  %v82_v20 = vrot.slane %v81_v18, 2 }
  0x29   :  { %v77_v24 = vmax.f32 %v75_v17, %v76_v19  ;;  %v83_v25 = vmax.f32 %v81_v18, %v82_v20 }
  0x2b   :  { %v78_v26 = vrot.slane %v77_v24, 1  ;;  %v84_v27 = vrot.slane %v83_v25, 1 }
  0x2d   :  { %v79_v30 = vmax.f32 %v77_v24, %v78_v26  ;;  %v85_v31 = vmax.f32 %v83_v25, %v84_v27 }
  0x2f   :  { %vm86_vm2 = vcmp.eq.f32.partialorder %v64_v10, %v79_v30  ;;  %vm87_vm3 = vcmp.eq.f32.partialorder %v65_v11, %v85_v31 }
  0x30   :  { %v88_v32 = vsel %vm86_vm2, %v72_v28, 1073741824  ;;  %v89_v33 = vsel %vm87_vm3, %v73_v29, 1073741824 }
  0x31   :  { %v90_v34 = vrot.slane %v88_v32, 4  ;;  %v99_v35 = vrot.slane %v89_v33, 4 }
  0x33   :  { %vm91_vm4 = vcmp.lt.s32.totalorder %v88_v32, %v90_v34  ;;  %vm100_vm5 = vcmp.lt.s32.totalorder %v89_v33, %v99_v35 }
  0x34   :  { %v92_v36 = vsel %vm91_vm4, %v88_v32, %v90_v34  ;;  %v101_v37 = vsel %vm100_vm5, %v89_v33, %v99_v35 }
  0x35   :  { %v93_v38 = vrot.slane %v92_v36, 2  ;;  %v102_v39 = vrot.slane %v101_v37, 2 }
  0x37   :  { %vm94_vm6 = vcmp.lt.s32.totalorder %v92_v36, %v93_v38  ;;  %vm103_vm7 = vcmp.lt.s32.totalorder %v101_v37, %v102_v39 }
  0x38   :  { %v95_v40 = vsel %vm94_vm6, %v92_v36, %v93_v38  ;;  %v104_v41 = vsel %vm103_vm7, %v101_v37, %v102_v39 }
  0x39   :  { %v96_v42 = vrot.slane %v95_v40, 1  ;;  %v105_v43 = vrot.slane %v104_v41, 1 }
  0x3b   :  { %vm97_vm9 = vcmp.lt.s32.totalorder %v95_v40, %v96_v42  ;;  %vm106_vm10 = vcmp.lt.s32.totalorder %v104_v41, %v105_v43 }
  0x3c   :  { %v98_v44 = vsel %vm97_vm9, %v95_v40, %v96_v42  ;;  %v107_v45 = vsel %vm106_vm10, %v104_v41, %v105_v43 }
  0x3d   :  { %v109_v46 = vsel %vm108_vm8, %v107_v45, %v98_v44 }
  0x3e   :  { %110 = vst [vmem:[#allocation7] sm:$0x3] %v109_v46 }
  0x3f   :  { %189 = shalt.err (!%p186_p10)
}
  0x40   :  { %120 = dma.vmem_to_hbm [thread:$0]  %s118_s19, 32, %s233_s1, [#allocation6]  }
  0x41   :  { %204 = dma.done.wait [#allocation6], 32  }
  0x42   :  { %205 = vsyncadd [#allocation6], 4294967264 }
  0x43   :  { %124 = vsyncpa [#allocation5], 1 }
  0x44   :  { %125 = vsyncpa [#allocation6], 1 }

</bundles_post_ra>
